<compile_context>
chip_gen: v5e
topology: v5e:2x2
jax: 0.10.0
libtpu: 0.0.40
codegen_flags: <defaults>
</compile_context>

<pallas_src>
import functools

import jax
import jax.numpy as jnp
from jax.experimental import pallas as pl
from jax.experimental.pallas import tpu as pltpu

_LANES = 128            # lane width
_ROW_ALIGN = 32         # sublane alignment (also satisfies int8 (32,128) tiling)
_MAX_BLOCK_ROWS = 1024  # (1024,128) f32 = 512 KiB per input buffer
_NUM_SPLITS = 2         # "parallel" row shards (v7x has 2 TensorCores)


def _masked_loss_kernel(p_ref, t_ref, m_ref, loss_acc_ref, cnt_acc_ref, *,
                        loss_type, eps, block_rows, blocks_total, rows_valid,
                        steps_per_split, needs_tail_mask):
    """One (block_rows, 128) streaming step of the masked-loss reduction.

    loss_acc_ref / cnt_acc_ref are (block_rows, 128) f32 output blocks for the
    current 'parallel' split; they stay resident in VMEM across the whole
    'arbitrary' (step) axis and act as element-wise accumulators.
    """
    step = pl.program_id(1)

    @pl.when(step == 0)
    def _():
        loss_acc_ref[...] = jnp.zeros_like(loss_acc_ref)
        cnt_acc_ref[...] = jnp.zeros_like(cnt_acc_ref)

    p = p_ref[...].astype(jnp.float32)
    t = t_ref[...].astype(jnp.float32)
    keep = m_ref[...] != 0

    d = p - t
    if loss_type == "mse":
        per_elem = d * d
    elif loss_type == "mae":
        per_elem = jnp.abs(d)
    elif loss_type == "rmse":
        per_elem = jnp.sqrt(d * d + eps)   # sqrt goes to the EUP slot; free under DMA
    else:
        raise NotImplementedError(loss_type)

    if needs_tail_mask:
        # Mask (a) rows of a partial tail block (undefined VMEM contents) and
        # (b) grid steps whose block index was clamped in the index_map
        # (duplicate coverage when blocks don't split evenly across cores).
        raw_blk = pl.program_id(0) * steps_per_split + step
        blk = jnp.minimum(raw_blk, blocks_total - 1)
        row = jax.lax.broadcasted_iota(jnp.int32, p.shape, 0)
        live = ((blk * block_rows + row) < rows_valid) & (raw_blk < blocks_total)
        keep = jnp.logical_and(keep, live)

    # Pure VPU accumulation (no XLU tree reduce, no scalar dependency chain).
    loss_acc_ref[...] += jnp.where(keep, per_elem, 0.0)
    cnt_acc_ref[...] += keep.astype(jnp.float32)


def _masked_loss_sums(preds, targets, valid, *, loss_type, eps):
    """Returns (sum of per-element loss over valid entries, valid-entry count)."""
    n = preds.size
    p = preds.reshape(-1)
    t = targets.reshape(-1)
    m = (valid.reshape(-1) != 0).astype(jnp.int8)   # 1 byte/elem mask

    # TODO(synk): for inputs already shaped (*, k*128) the flatten+pad copy could
    # be skipped entirely; kept for generality (pad is only to 32*128 elements).
    align = _ROW_ALIGN * _LANES
    n_pad = pl.cdiv(n, align) * align
    pad = n_pad - n
    if pad:
        p = jnp.pad(p, (0, pad))          # native dtype, no f32 up-cast copy
        t = jnp.pad(t, (0, pad))
        m = jnp.pad(m, (0, pad))          # padded mask entries are 0 -> ignored
    rows = n_pad // _LANES                # multiple of _ROW_ALIGN
    p2 = p.reshape(rows, _LANES)
    t2 = t.reshape(rows, _LANES)
    m2 = m.reshape(rows, _LANES)

    block_rows = rows if rows <= _MAX_BLOCK_ROWS else _MAX_BLOCK_ROWS
    blocks_total = pl.cdiv(rows, block_rows)
    num_splits = _NUM_SPLITS if blocks_total >= _NUM_SPLITS else 1
    steps_per_split = pl.cdiv(blocks_total, num_splits)
    needs_tail_mask = (blocks_total * block_rows != rows) or (
        num_splits * steps_per_split != blocks_total)

    def in_map(s, i):
        # Clamp so a split never requests a block past the array; clamped
        # (duplicate) blocks are fully masked inside the kernel.
        return (jnp.minimum(s * steps_per_split + i, blocks_total - 1), 0)

    def out_map(s, i):
        return (s, 0, 0)

    kernel = functools.partial(
        _masked_loss_kernel, loss_type=loss_type, eps=eps,
        block_rows=block_rows, blocks_total=blocks_total, rows_valid=rows,
        steps_per_split=steps_per_split, needs_tail_mask=needs_tail_mask)

    in_spec = pl.BlockSpec((block_rows, _LANES), in_map)
    acc_spec = pl.BlockSpec((None, block_rows, _LANES), out_map)

    loss_parts, cnt_parts = pl.pallas_call(
        kernel,
        out_shape=(
            jax.ShapeDtypeStruct((num_splits, block_rows, _LANES), jnp.float32),
            jax.ShapeDtypeStruct((num_splits, block_rows, _LANES), jnp.float32),
        ),
        grid_spec=pltpu.PrefetchScalarGridSpec(
            num_scalar_prefetch=0,
            grid=(num_splits, steps_per_split),
            in_specs=[in_spec, in_spec, in_spec],
            out_specs=[acc_spec, acc_spec],
        ),
        compiler_params=pltpu.CompilerParams(
            dimension_semantics=("parallel", "arbitrary"),
        ),
    )(p2, t2, m2)

    # Tiny final reduction of the per-split accumulators in plain XLA.
    return jnp.sum(loss_parts), jnp.sum(cnt_parts)


def _legit(batch_dict, key):
    if key not in batch_dict:
        return False
    if batch_dict[key] is None:
        return False
    if batch_dict[key].size == 0:
        return False
    return True


class ScalarsPredictionsLoss:
    """JAX/Pallas port of mammal.losses.ScalarsPredictionsLoss (forward only)."""

    def __init__(
        self,
        *,
        loss_type: str,
        loss_weight: float | None = None,
        pred_key: str = "scalars_prediction_head_logits",
        labels_scalars_values_key: str = "labels_scalars_values",
        labels_scalars_valid_mask_key: str = "labels_scalars_valid_mask",
        eps: float = 1e-6,
    ) -> None:
        if loss_type not in ("mse", "mae", "rmse"):
            raise NotImplementedError(loss_type)
        self.loss_type = loss_type
        self.loss_weight = 1.0 if loss_weight is None else loss_weight
        self.pred_key = pred_key
        self.labels_scalars_values_key = labels_scalars_values_key
        self.labels_scalars_valid_mask_key = labels_scalars_valid_mask_key
        self.eps = eps

    def __call__(self, batch_dict: dict):
        if (
            not _legit(batch_dict, self.pred_key)
            or not _legit(batch_dict, self.labels_scalars_values_key)
            or not _legit(batch_dict, self.labels_scalars_valid_mask_key)
        ):
            return 0.0
        preds = batch_dict[self.pred_key]
        targets = batch_dict[self.labels_scalars_values_key]
        valid = batch_dict[self.labels_scalars_valid_mask_key]
        assert preds.shape == targets.shape
        assert targets.shape == valid.shape

        loss_sum, valid_cnt = _masked_loss_sums(
            preds, targets, valid, loss_type=self.loss_type, eps=self.eps
        )
        # Mean over valid elements only, then weight (NaN if no valid elements,
        # matching torch's mean over an empty selection).
        return (loss_sum / valid_cnt) * jnp.float32(self.loss_weight)


if __name__ == "__main__":
    root = jax.random.PRNGKey(0)
    kp, kt, kv, kp2, kt2, kv2 = jax.random.split(root, 6)

    def ref_loss(p, t, v, lt, w, eps=1e-6):
        m = v.astype(jnp.float32)
        d = (p - t).astype(jnp.float32)
        if lt == "mse":
            per = d * d
        elif lt == "mae":
            per = jnp.abs(d)
        else:
            per = jnp.sqrt(d * d + eps)
        return (jnp.sum(per * m) / jnp.sum(m)) * w

    # --- small demo: batch=2, 8 scalar predictions per sample ---
    B, S = 2, 8
    preds = jax.random.normal(kp, (B, S), dtype=jnp.float32)
    targets = jax.random.normal(kt, (B, S), dtype=jnp.float32)
    valid = jax.random.bernoulli(kv, p=0.6, shape=(B, S))
    valid = valid.at[0, 0].set(True)   # guarantee at least one valid element

    batch_dict = {
        "scalars_prediction_head_logits": preds,
        "labels_scalars_values": targets,
        "labels_scalars_valid_mask": valid,
    }

    for lt in ("mse", "mae", "rmse"):
        loss_mod = ScalarsPredictionsLoss(loss_type=lt, loss_weight=0.5)
        out = jax.block_until_ready(loss_mod(batch_dict))
        ref = ref_loss(preds, targets, valid, lt, 0.5)
        assert jnp.allclose(out, ref, rtol=1e-5, atol=1e-6), (lt, out, ref)

    # --- larger case: multi-block grid, partial tail block, 2-way core split ---
    shape_l = (300, 1000)
    preds_l = jax.random.normal(kp2, shape_l, dtype=jnp.float32)
    targets_l = jax.random.normal(kt2, shape_l, dtype=jnp.float32)
    valid_l = jax.random.bernoulli(kv2, p=0.5, shape=shape_l)
    batch_l = {
        "scalars_prediction_head_logits": preds_l,
        "labels_scalars_values": targets_l,
        "labels_scalars_valid_mask": valid_l,
    }
    loss_mod = ScalarsPredictionsLoss(loss_type="mse", loss_weight=1.0)
    out_l = jax.block_until_ready(loss_mod(batch_l))
    ref_l = ref_loss(preds_l, targets_l, valid_l, "mse", 1.0)
    assert jnp.allclose(out_l, ref_l, rtol=1e-4, atol=1e-5), (out_l, ref_l)

    # missing-key path returns plain 0.0
    assert ScalarsPredictionsLoss(loss_type="mse")({}) == 0.0

    print("KERNEL_OK")
</pallas_src>

<mosaic_0001>
module attributes {stable_mosaic.version = 11 : i64} {
  func.func @_masked_loss_kernel(%arg0: i32, %arg1: i32, %arg2: memref<32x128xf32, #tpu.memory_space<vmem>>, %arg3: memref<32x128xf32, #tpu.memory_space<vmem>>, %arg4: memref<32x128xi8, #tpu.memory_space<vmem>>, %arg5: memref<1x32x128xf32, #tpu.memory_space<vmem>>, %arg6: memref<1x32x128xf32, #tpu.memory_space<vmem>>) attributes {dimension_semantics = [#tpu.dimension_semantics<parallel>, #tpu.dimension_semantics<arbitrary>], iteration_bounds = array<i64: 1, 1>, scalar_prefetch = 0 : i64, scratch_operands = 0 : i64, tpu.core_type = #tpu.core_type<tc>, window_params = [{transform_indices = @transform_0, window_bounds = array<i64: 32, 128>}, {transform_indices = @transform_1, window_bounds = array<i64: 32, 128>}, {transform_indices = @transform_2, window_bounds = array<i64: 32, 128>}, {transform_indices = @transform_3, window_bounds = array<i64: 1, 32, 128>}, {transform_indices = @transform_4, window_bounds = array<i64: 1, 32, 128>}]} {
    %c0_i32 = arith.constant 0 : i32
    %0 = arith.cmpi eq, %arg1, %c0_i32 : i32
    %1 = arith.extui %0 : i1 to i32
    %c0_i32_0 = arith.constant 0 : i32
    %2 = arith.cmpi ne, %1, %c0_i32_0 : i32
    scf.if %2 {
      %cst_18 = arith.constant 0.000000e+00 : f32
      %26 = vector.broadcast %cst_18 : f32 to vector<32x128xf32>
      %c0_19 = arith.constant 0 : index
      %c0_20 = arith.constant 0 : index
      %c0_21 = arith.constant 0 : index
      %27 = vector.load %arg5[%c0_19, %c0_20, %c0_21] : memref<1x32x128xf32, #tpu.memory_space<vmem>>, vector<1x32x128xf32>
      %28 = vector.shape_cast %27 : vector<1x32x128xf32> to vector<32x128xf32>
      %29 = vector.shape_cast %26 : vector<32x128xf32> to vector<1x32x128xf32>
      tpu.vector_store %arg5[%c0_19, %c0_20, %c0_21], %29 {strides = array<i32>} : memref<1x32x128xf32, #tpu.memory_space<vmem>>, vector<1x32x128xf32>,
      %cst_22 = arith.constant 0.000000e+00 : f32
      %30 = vector.broadcast %cst_22 : f32 to vector<32x128xf32>
      %c0_23 = arith.constant 0 : index
      %c0_24 = arith.constant 0 : index
      %c0_25 = arith.constant 0 : index
      %31 = vector.load %arg6[%c0_23, %c0_24, %c0_25] : memref<1x32x128xf32, #tpu.memory_space<vmem>>, vector<1x32x128xf32>
      %32 = vector.shape_cast %31 : vector<1x32x128xf32> to vector<32x128xf32>
      %33 = vector.shape_cast %30 : vector<32x128xf32> to vector<1x32x128xf32>
      tpu.vector_store %arg6[%c0_23, %c0_24, %c0_25], %33 {strides = array<i32>} : memref<1x32x128xf32, #tpu.memory_space<vmem>>, vector<1x32x128xf32>,
    } else {
    }
    %c0 = arith.constant 0 : index
    %c0_1 = arith.constant 0 : index
    %3 = vector.load %arg2[%c0, %c0_1] : memref<32x128xf32, #tpu.memory_space<vmem>>, vector<32x128xf32>
    %c0_2 = arith.constant 0 : index
    %c0_3 = arith.constant 0 : index
    %4 = vector.load %arg3[%c0_2, %c0_3] : memref<32x128xf32, #tpu.memory_space<vmem>>, vector<32x128xf32>
    %c0_4 = arith.constant 0 : index
    %c0_5 = arith.constant 0 : index
    %5 = vector.load %arg4[%c0_4, %c0_5] : memref<32x128xi8, #tpu.memory_space<vmem>>, vector<32x128xi8>
    %c0_i8 = arith.constant 0 : i8
    %6 = vector.broadcast %c0_i8 : i8 to vector<32x128xi8>
    %7 = arith.cmpi ne, %5, %6 : vector<32x128xi8>
    %8 = arith.subf %3, %4 : vector<32x128xf32>
    %9 = arith.mulf %8, %8 : vector<32x128xf32>
    %c0_6 = arith.constant 0 : index
    %c0_7 = arith.constant 0 : index
    %c0_8 = arith.constant 0 : index
    %10 = vector.load %arg5[%c0_6, %c0_7, %c0_8] : memref<1x32x128xf32, #tpu.memory_space<vmem>>, vector<1x32x128xf32>
    %11 = vector.shape_cast %10 : vector<1x32x128xf32> to vector<32x128xf32>
    %cst = arith.constant 0.000000e+00 : f32
    %12 = vector.broadcast %cst : f32 to vector<32x128xf32>
    %13 = arith.select %7, %9, %12 : vector<32x128xi1>, vector<32x128xf32>
    %14 = arith.addf %11, %13 : vector<32x128xf32>
    %c0_9 = arith.constant 0 : index
    %c0_10 = arith.constant 0 : index
    %c0_11 = arith.constant 0 : index
    %15 = vector.load %arg5[%c0_9, %c0_10, %c0_11] : memref<1x32x128xf32, #tpu.memory_space<vmem>>, vector<1x32x128xf32>
    %16 = vector.shape_cast %15 : vector<1x32x128xf32> to vector<32x128xf32>
    %17 = vector.shape_cast %14 : vector<32x128xf32> to vector<1x32x128xf32>
    tpu.vector_store %arg5[%c0_9, %c0_10, %c0_11], %17 {strides = array<i32>} : memref<1x32x128xf32, #tpu.memory_space<vmem>>, vector<1x32x128xf32>,
    %c0_12 = arith.constant 0 : index
    %c0_13 = arith.constant 0 : index
    %c0_14 = arith.constant 0 : index
    %18 = vector.load %arg6[%c0_12, %c0_13, %c0_14] : memref<1x32x128xf32, #tpu.memory_space<vmem>>, vector<1x32x128xf32>
    %19 = vector.shape_cast %18 : vector<1x32x128xf32> to vector<32x128xf32>
    %20 = arith.extui %7 : vector<32x128xi1> to vector<32x128xi32>
    %21 = arith.sitofp %20 : vector<32x128xi32> to vector<32x128xf32>
    %22 = arith.addf %19, %21 : vector<32x128xf32>
    %c0_15 = arith.constant 0 : index
    %c0_16 = arith.constant 0 : index
    %c0_17 = arith.constant 0 : index
    %23 = vector.load %arg6[%c0_15, %c0_16, %c0_17] : memref<1x32x128xf32, #tpu.memory_space<vmem>>, vector<1x32x128xf32>
    %24 = vector.shape_cast %23 : vector<1x32x128xf32> to vector<32x128xf32>
    %25 = vector.shape_cast %22 : vector<32x128xf32> to vector<1x32x128xf32>
    tpu.vector_store %arg6[%c0_15, %c0_16, %c0_17], %25 {strides = array<i32>} : memref<1x32x128xf32, #tpu.memory_space<vmem>>, vector<1x32x128xf32>,
    return
  }
  func.func @transform_0(%arg0: i32, %arg1: i32) -> (i32, i32) {
    %c1_i32 = arith.constant 1 : i32
    %0 = arith.muli %arg0, %c1_i32 : i32
    %1 = arith.addi %0, %arg1 : i32
    %c0_i32 = arith.constant 0 : i32
    %2 = arith.minsi %1, %c0_i32 : i32
    %c0_i32_0 = arith.constant 0 : i32
    %c0_i32_1 = arith.constant 0 : i32
    return %2, %c0_i32_0 : i32, i32
  }
  func.func @transform_1(%arg0: i32, %arg1: i32) -> (i32, i32) {
    %c1_i32 = arith.constant 1 : i32
    %0 = arith.muli %arg0, %c1_i32 : i32
    %1 = arith.addi %0, %arg1 : i32
    %c0_i32 = arith.constant 0 : i32
    %2 = arith.minsi %1, %c0_i32 : i32
    %c0_i32_0 = arith.constant 0 : i32
    %c0_i32_1 = arith.constant 0 : i32
    return %2, %c0_i32_0 : i32, i32
  }
  func.func @transform_2(%arg0: i32, %arg1: i32) -> (i32, i32) {
    %c1_i32 = arith.constant 1 : i32
    %0 = arith.muli %arg0, %c1_i32 : i32
    %1 = arith.addi %0, %arg1 : i32
    %c0_i32 = arith.constant 0 : i32
    %2 = arith.minsi %1, %c0_i32 : i32
    %c0_i32_0 = arith.constant 0 : i32
    %c0_i32_1 = arith.constant 0 : i32
    return %2, %c0_i32_0 : i32, i32
  }
  func.func @transform_3(%arg0: i32, %arg1: i32) -> (i32, i32, i32) {
    %c0_i32 = arith.constant 0 : i32
    %c0_i32_0 = arith.constant 0 : i32
    %c0_i32_1 = arith.constant 0 : i32
    return %arg0, %c0_i32, %c0_i32_0 : i32, i32, i32
  }
  func.func @transform_4(%arg0: i32, %arg1: i32) -> (i32, i32, i32) {
    %c0_i32 = arith.constant 0 : i32
    %c0_i32_0 = arith.constant 0 : i32
    %c0_i32_1 = arith.constant 0 : i32
    return %arg0, %c0_i32, %c0_i32_0 : i32, i32, i32
  }
}

</mosaic_0001>

<bundles_post_ra>
// kernel: tpu_custom_call.1
= control target key start
LH: loop header
LB: loop body
LE: loop exit
PB: predicated region body
PF: predicated region fallthrough
CT: control target
= control target key end

     0   :  { %10 = vsyncpa [#allocation3], 0  ;;  %s458_s0 = inlined_call_operand.hbm [shape: f32[32,128], index: 0, kind: input, shape index: {}]   ;;  %s459_s1 = inlined_call_operand.hbm [shape: f32[32,128], index: 1, kind: input, shape index: {}]   ;;  %s460_s2 = inlined_call_operand.hbm [shape: s8[32,128], index: 2, kind: input, shape index: {}]   ;;  %s461_s3 = inlined_call_operand.hbm [shape: f32[1,32,128], index: 3, kind: output, shape index: {0}]   ;;  %s462_s4 = inlined_call_operand.hbm [shape: f32[1,32,128], index: 4, kind: output, shape index: {1}]  }
   0x1   :  { %11 = vsyncpa [#allocation6], 0 }
   0x2   :  { %12 = vsyncpa [#allocation4], 0 }
   0x3   :  { %13 = vsyncpa [#allocation10], 0  ;;  %s43_s17 = sshll.u32 %s459_s1, 4  ;;  %s373_s18 = smov [#allocation5]   ;;  %s44_s17 = int_to_ptr.hbm [resolvable:$true] %s43_s17 }
   0x4   :  { %s45_s19 = sshll.u32 %s373_s18, 4  ;;  %s24_s22 = sshll.u32 %s458_s0, 4  ;;  %s46_s19 = int_to_ptr.vmem [resolvable:$true] %s45_s19  ;;  %s25_s22 = int_to_ptr.hbm [resolvable:$true] %s24_s22 }
   0x5   :  { %s374_s23 = smov 128   ;;  %s375_s24 = smov 8  }
   0x6   :  { %51 = dma.hbm_to_vmem [thread:$0]  %s44_s17, 512, %s46_s19, [#allocation6], %s374_s23, %s374_s23, %s375_s24  }
   0x7   :  { %s376_s25 = smov [#allocation2]   ;;  %s62_s1 = sshll.u32 %s460_s2, 4  ;;  %s63_s1 = int_to_ptr.hbm [resolvable:$true] %s62_s1 }
   0x8   :  { %s26_s26 = sshll.u32 %s376_s25, 4  ;;  %s377_s0 = smov [#allocation7]   ;;  %s27_s26 = int_to_ptr.vmem [resolvable:$true] %s26_s26 }
   0x9   :  { %32 = dma.hbm_to_vmem [thread:$0]  %s25_s22, 512, %s27_s26, [#allocation3], %s374_s23, %s374_s23, %s375_s24  }
   0xa   :  { %s64_s29 = sshll.u32 %s377_s0, 4  ;;  %s65_s29 = int_to_ptr.vmem [resolvable:$true] %s64_s29 }
   0xb   :  { %67 = dma.hbm_to_vmem [thread:$0]  %s63_s1, 128, %s65_s29, [#allocation6]  }
   0xc   :  { %365 = dma.done.wait [#allocation3], 512  }
   0xd   :  { %366 = vsyncadd [#allocation3], 4294966784 }
   0xe   :  { %367 = dma.done.wait [#allocation6], 640  }
   0xf   :  { %368 = vsyncadd [#allocation6], 4294966656  ;;  %v105_v0 = vld [vmem:[#allocation2] sm:$0xff]  ;;  %v106_v3 = vld [vmem:[#allocation2 + $0x8] sm:$0xff]  ;;  %v378_v6 = vmov 0   ;;  %s379_s2 = smov [#allocation8]  }
  0x10   :  { %v109_v1 = vld [vmem:[#allocation5] sm:$0xff]  ;;  %v110_v4 = vld [vmem:[#allocation5 + $0x8] sm:$0xff]  ;;  %v107_v5 = vld [vmem:[#allocation2 + $0x10] sm:$0xff]  ;;  %s192_s30 = sshll.u32 %s379_s2, 4  ;;  %s194_s7 = sshll.u32 %s461_s3, 4  ;;  %v380_v46 = vmov 0.0   ;;  %s193_s30 = int_to_ptr.vmem [resolvable:$true] %s192_s30  ;;  %s195_s7 = int_to_ptr.hbm [resolvable:$true] %s194_s7 }
  0x11   :  { %v113_v2 = vld [vmem:[#allocation7] sm:$0xff]  ;;  %v111_v8 = vld [vmem:[#allocation5 + $0x10] sm:$0xff]  ;;  %v108_v9 = vld [vmem:[#allocation2 + $0x18] sm:$0xff]  ;;  %v115_v13 = vsub.f32 %v105_v0, %v109_v1  ;;  %v116_v14 = vsub.f32 %v106_v3, %v110_v4  ;;  %s381_s8 = smov [#allocation9]   ;;  %s207_s11 = sshll.u32 %s462_s4, 4  ;;  %s208_s11 = int_to_ptr.hbm [resolvable:$true] %s207_s11 }
  0x12   :  { %vm114_vm0 = vnez %v113_v2  ;;  %v112_v10 = vld [vmem:[#allocation5 + $0x18] sm:$0xff]  ;;  %v117_v19 = vsub.f32 %v107_v5, %v111_v8  ;;  %s205_s9 = sshll.u32 %s381_s8, 4  ;;  %s206_s9 = int_to_ptr.vmem [resolvable:$true] %s205_s9 }
  0x13   :  { %v127_v7 = vsel %vm114_vm0, 16843009, %v378_v6  ;;  %v118_v20 = vsub.f32 %v108_v9, %v112_v10  ;;  %v119_v25 = vmul.f32 %v115_v13, %v115_v13  ;;  %v120_v26 = vmul.f32 %v116_v14, %v116_v14 }
  0x14   :  { %v128_v11 = vunpack.c.0.s8 %v127_v7  ;;  %v129_v12 = vunpack.c.1.s8 %v127_v7  ;;  %v130_v15 = vunpack.c.2.s8 %v127_v7  ;;  %v131_v16 = vunpack.c.3.s8 %v127_v7 }
  0x15   :  { %v121_v29 = vmul.f32 %v117_v19, %v117_v19  ;;  %v122_v30 = vmul.f32 %v118_v20, %v118_v20 }
  0x16   :  { %v132_v17 = vpack.c.b16 %v128_v11, %v128_v11  ;;  %v134_v18 = vpack.c.b16 %v129_v12, %v129_v12  ;;  %v136_v21 = vpack.c.b16 %v130_v15, %v130_v15  ;;  %v138_v22 = vpack.c.b16 %v131_v16, %v131_v16 }
  0x18   :  { %v133_v23 = vpack.c.b8 %v132_v17, %v132_v17  ;;  %v135_v24 = vpack.c.b8 %v134_v18, %v134_v18  ;;  %v137_v27 = vpack.c.b8 %v136_v21, %v136_v21  ;;  %v139_v28 = vpack.c.b8 %v138_v22, %v138_v22 }
  0x1a   :  { %vm140_vm1 = vnez %v133_v23  ;;  %vm141_vm2 = vnez %v135_v24  ;;  %vm142_vm3 = vnez %v137_v27  ;;  %vm143_vm4 = vnez %v139_v28 }
  0x1b   :  { %v144_v31 = vsel %vm140_vm1, 16843009, %v378_v6  ;;  %v145_v32 = vsel %vm141_vm2, 16843009, %v378_v6  ;;  %v146_v35 = vsel %vm142_vm3, 16843009, %v378_v6 }
  0x1c   :  { %v148_v33 = vunpack.c.0.s8 %v144_v31  ;;  %v149_v34 = vunpack.c.0.s8 %v145_v32  ;;  %v147_v36 = vsel %vm143_vm4, 16843009, %v378_v6  ;;  %v150_v37 = vunpack.c.0.s8 %v146_v35 }
  0x1d   :  { %v151_v38 = vunpack.c.0.s8 %v147_v36 }
  0x1e   :  { %vm152_vm5 = vcmp.ne.s32.totalorder %v148_v33, 0  ;;  %vm422_vm6 = vcmp.ne.s32.totalorder %v149_v34, 0  ;;  %vm428_vm7 = vcmp.ne.s32.totalorder %v150_v37, 0 }
  0x1f   :  { %v156_v40 = vsel %vm152_vm5, %v119_v25, 0.0  ;;  %v157_v41 = vsel %vm422_vm6, %v120_v26, 0.0  ;;  %vm432_vm8 = vcmp.ne.s32.totalorder %v151_v38, 0  ;;  %v158_v44 = vsel %vm428_vm7, %v121_v29, 0.0 }
  0x20   :  { %v159_v45 = vsel %vm432_vm8, %v122_v30, 0.0  ;;  %v232_v47 = vsel %vm152_vm5, 1.0, %v380_v46  ;;  %v233_v48 = vsel %vm422_vm6, 1.0, %v380_v46  ;;  %164 = vst [vmem:[#allocation8] sm:$0xff] %v156_v40  ;;  %v234_v49 = vsel %vm428_vm7, 1.0, %v380_v46 }
  0x21   :  { %v235_v50 = vsel %vm432_vm8, 1.0, %v380_v46  ;;  %165 = vst [vmem:[#allocation8 + $0x8] sm:$0xff] %v157_v41 }
  0x22   :  { %166 = vst [vmem:[#allocation8 + $0x10] sm:$0xff] %v158_v44 }
  0x23   :  { %167 = vst [vmem:[#allocation8 + $0x18] sm:$0xff] %v159_v45 }
  0x24   :  { %184 = vst [vmem:[#allocation9] sm:$0xff] %v232_v47  ;;  %200 = dma.vmem_to_hbm [thread:$0]  %s193_s30, 512, %s195_s7, [#allocation4], %s374_s23, %s374_s23, %s375_s24  }
  0x25   :  { %185 = vst [vmem:[#allocation9 + $0x8] sm:$0xff] %v233_v48 }
  0x26   :  { %186 = vst [vmem:[#allocation9 + $0x10] sm:$0xff] %v234_v49 }
  0x27   :  { %187 = vst [vmem:[#allocation9 + $0x18] sm:$0xff] %v235_v50 }
  0x28   :  { %213 = dma.vmem_to_hbm [thread:$0]  %s206_s9, 512, %s208_s11, [#allocation10], %s374_s23, %s374_s23, %s375_s24  }
  0x29   :  { %369 = dma.done.wait [#allocation4], 512  }
  0x2a   :  { %370 = vsyncadd [#allocation4], 4294966784 }
  0x2b   :  { %371 = dma.done.wait [#allocation10], 512  }
  0x2c   :  { %372 = vsyncadd [#allocation10], 4294966784 }
  0x2d   :  { %222 = vsyncpa [#allocation3], 1 }
  0x2e   :  { %223 = vsyncpa [#allocation6], 1 }
  0x2f   :  { %224 = vsyncpa [#allocation4], 1 }
  0x30   :  { %225 = vsyncpa [#allocation10], 1 }

</bundles_post_ra>
